<compile_context>
chip_gen: v5e
topology: v5e:2x2
jax: 0.10.0
libtpu: 0.0.40
codegen_flags: <defaults>
</compile_context>

<pallas_src>
import functools

import jax
import jax.numpy as jnp
from jax.experimental import pallas as pl
from jax.experimental.pallas import tpu as pltpu


def _ir_padding_kernel(checker_ref, x_ref, o_ref, *, pad_h, pad_w):
    """checker_ref: (PH, PW); x_ref: (TC, H, W); o_ref: (TC, PH, PW)."""
    tc, H, W = x_ref.shape
    # Pass 1: aligned, full-tile store of the border checkerboard pattern
    # (checker block is resident in VMEM across all grid steps).
    o_ref[...] = jnp.broadcast_to(checker_ref[...][None], o_ref.shape)
    # Pass 2: overwrite the interior window with the input planes in a single
    # batched store over all TC planes.
    o_ref[:, pl.ds(pad_h, H), pl.ds(pad_w, W)] = x_ref[...]


def _round_up(n, m):
    return -(-n // m) * m


def _choose_block_planes(num_planes, per_plane_vmem_bytes,
                         vmem_budget_bytes=5 << 20,
                         min_split_vmem_bytes=2 << 20):
    """Largest divisor of num_planes whose (in + out) block fits the budget."""
    cap = max(1, vmem_budget_bytes // max(per_plane_vmem_bytes, 1))
    tc = 1
    for d in range(min(num_planes, cap), 0, -1):
        if num_planes % d == 0:
            tc = d
            break
    # Prefer at least two grid steps (v7x shards the "parallel" axis over its
    # two TensorCores) as long as each block stays comfortably large.
    if (tc == num_planes and num_planes % 2 == 0
            and (num_planes // 2) * per_plane_vmem_bytes >= min_split_vmem_bytes):
        tc = num_planes // 2
    return tc


def ir_padding(x, pad_h, pad_w):
    B, C, H, W = x.shape
    PH, PW = H + 2 * pad_h, W + 2 * pad_w
    BC = B * C
    xf = x.reshape(BC, H, W)  # free reshape: collapse batch and channel

    # Checkerboard border pattern, computed once outside the kernel.
    # Note: for unsigned integer dtypes the -1 wraps (same as the old kernel).
    hh = jnp.arange(PH, dtype=jnp.int32)[:, None]
    ww = jnp.arange(PW, dtype=jnp.int32)[None, :]
    one = jnp.ones((), dtype=x.dtype)
    checker = jnp.where((hh & 1) == (ww & 1), one, -one)

    itemsize = jnp.dtype(x.dtype).itemsize
    # Per-plane VMEM footprint of (input block + output block) using the
    # padded on-chip layout: sublanes round up to 8, lanes round up to 128.
    per_plane_vmem = (_round_up(H, 8) * _round_up(W, 128)
                      + _round_up(PH, 8) * _round_up(PW, 128)) * itemsize
    tc = _choose_block_planes(BC, per_plane_vmem)
    grid = (BC // tc,)

    kernel = functools.partial(_ir_padding_kernel, pad_h=pad_h, pad_w=pad_w)
    out = pl.pallas_call(
        kernel,
        out_shape=jax.ShapeDtypeStruct((BC, PH, PW), x.dtype),
        grid=grid,
        in_specs=[
            # Constant block: fetched once, stays resident across grid steps.
            pl.BlockSpec((PH, PW), lambda i: (0, 0)),
            pl.BlockSpec((tc, H, W), lambda i: (i, 0, 0)),
        ],
        out_specs=pl.BlockSpec((tc, PH, PW), lambda i: (i, 0, 0)),
        compiler_params=pltpu.CompilerParams(
            dimension_semantics=("parallel",)),
    )(checker, xf)
    return out.reshape(B, C, PH, PW)


def ir_padding_ref(x, pad_h, pad_w):
    # Pure-JAX reference mirroring the PyTorch semantics.
    B, C, H, W = x.shape
    PH, PW = H + 2 * pad_h, W + 2 * pad_w
    hh = jnp.arange(PH)[:, None]
    ww = jnp.arange(PW)[None, :]
    checker = jnp.where((hh % 2) == (ww % 2), 1, -1).astype(x.dtype)
    padded = jnp.pad(x, ((0, 0), (0, 0), (pad_h, pad_h), (pad_w, pad_w)))
    interior = ((hh >= pad_h) & (hh < PH - pad_h)
                & (ww >= pad_w) & (ww < PW - pad_w))
    return jnp.where(interior[None, None], padded, checker[None, None])


if __name__ == "__main__":
    key = jax.random.PRNGKey(0)
    k1, k2 = jax.random.split(key)

    # Primary case (matches the module's typical use).
    B, C, H, W = 2, 4, 16, 16
    pad_h, pad_w = 1, 1
    x = jax.random.normal(k1, (B, C, H, W), dtype=jnp.float32)
    out = jax.block_until_ready(ir_padding(x, pad_h, pad_w))
    ref = ir_padding_ref(x, pad_h, pad_w)
    assert out.shape == (B, C, H + 2 * pad_h, W + 2 * pad_w)
    assert out.dtype == x.dtype
    assert bool(jnp.allclose(out, ref)), "Pallas output mismatch vs reference"

    # Secondary case: asymmetric padding, different plane count.
    x2 = jax.random.normal(k2, (2, 3, 8, 16), dtype=jnp.float32)
    out2 = jax.block_until_ready(ir_padding(x2, 2, 3))
    assert bool(jnp.allclose(out2, ir_padding_ref(x2, 2, 3))), "mismatch (case 2)"

    print("KERNEL_OK")
</pallas_src>

<mosaic_0001>
module attributes {stable_mosaic.version = 11 : i64} {
  func.func @_ir_padding_kernel(%arg0: i32, %arg1: memref<18x18xf32, #tpu.memory_space<vmem>>, %arg2: memref<8x16x16xf32, #tpu.memory_space<vmem>>, %arg3: memref<8x18x18xf32, #tpu.memory_space<vmem>>) attributes {dimension_semantics = [#tpu.dimension_semantics<parallel>], iteration_bounds = array<i64: 1>, scalar_prefetch = 0 : i64, scratch_operands = 0 : i64, tpu.core_type = #tpu.core_type<tc>, window_params = [{pipeline_mode = #tpu.pipeline_mode<synchronous>, transform_indices = @transform_0, window_bounds = array<i64: 18, 18>}, {transform_indices = @transform_1, window_bounds = array<i64: 8, 16, 16>}, {transform_indices = @transform_2, window_bounds = array<i64: 8, 18, 18>}]} {
    %c0 = arith.constant 0 : index
    %c0_0 = arith.constant 0 : index
    %0 = vector.load %arg1[%c0, %c0_0] : memref<18x18xf32, #tpu.memory_space<vmem>>, vector<18x18xf32>
    %1 = vector.shape_cast %0 : vector<18x18xf32> to vector<1x18x18xf32>
    %2 = vector.shape_cast %1 : vector<1x18x18xf32> to vector<1x18x18xf32>
    %3 = vector.broadcast %2 : vector<1x18x18xf32> to vector<8x18x18xf32>
    %c0_1 = arith.constant 0 : index
    %c0_2 = arith.constant 0 : index
    %c0_3 = arith.constant 0 : index
    %4 = vector.load %arg3[%c0_1, %c0_2, %c0_3] : memref<8x18x18xf32, #tpu.memory_space<vmem>>, vector<8x18x18xf32>
    tpu.vector_store %arg3[%c0_1, %c0_2, %c0_3], %3 {strides = array<i32>} : memref<8x18x18xf32, #tpu.memory_space<vmem>>, vector<8x18x18xf32>,
    %c0_4 = arith.constant 0 : index
    %c0_5 = arith.constant 0 : index
    %c0_6 = arith.constant 0 : index
    %5 = vector.load %arg2[%c0_4, %c0_5, %c0_6] : memref<8x16x16xf32, #tpu.memory_space<vmem>>, vector<8x16x16xf32>
    %c0_7 = arith.constant 0 : index
    %c1 = arith.constant 1 : index
    %c1_8 = arith.constant 1 : index
    %6 = vector.load %arg3[%c0_7, %c1, %c1_8] : memref<8x18x18xf32, #tpu.memory_space<vmem>>, vector<8x16x16xf32>
    tpu.vector_store %arg3[%c0_7, %c1, %c1_8], %5 {strides = array<i32>} : memref<8x18x18xf32, #tpu.memory_space<vmem>>, vector<8x16x16xf32>,
    return
  }
  func.func @transform_0(%arg0: i32) -> (i32, i32) {
    %c0_i32 = arith.constant 0 : i32
    %c0_i32_0 = arith.constant 0 : i32
    %c0_i32_1 = arith.constant 0 : i32
    return %c0_i32, %c0_i32_0 : i32, i32
  }
  func.func @transform_1(%arg0: i32) -> (i32, i32, i32) {
    %c0_i32 = arith.constant 0 : i32
    %c0_i32_0 = arith.constant 0 : i32
    %c0_i32_1 = arith.constant 0 : i32
    return %arg0, %c0_i32, %c0_i32_0 : i32, i32, i32
  }
  func.func @transform_2(%arg0: i32) -> (i32, i32, i32) {
    %c0_i32 = arith.constant 0 : i32
    %c0_i32_0 = arith.constant 0 : i32
    %c0_i32_1 = arith.constant 0 : i32
    return %arg0, %c0_i32, %c0_i32_0 : i32, i32, i32
  }
}

</mosaic_0001>

<bundles_post_ra>
// kernel: tpu_custom_call.1
= control target key start
LH: loop header
LB: loop body
LE: loop exit
PB: predicated region body
PF: predicated region fallthrough
CT: control target
= control target key end

     0   :  { %7 = vsyncpa [#allocation3], 0  ;;  %s410_s0 = inlined_call_operand.hbm [shape: f32[18,18], index: 0, kind: input, shape index: {}]   ;;  %s411_s1 = inlined_call_operand.hbm [shape: f32[8,16,16], index: 1, kind: input, shape index: {}]   ;;  %s412_s2 = inlined_call_operand.vmem [shape: f32[8,18,18], index: 2, kind: output, shape index: {}]  }
   0x1   :  { %s13_s11 = sshll.u32 %s410_s0, 4  ;;  %s14_s11 = int_to_ptr.hbm [resolvable:$true] %s13_s11 }
   0x2   :  { %8 = vsyncpa [#allocation5], 0  ;;  %s232_s12 = smov [#allocation2]   ;;  %s26_s16 = sshll.u32 %s411_s1, 4  ;;  %s27_s16 = int_to_ptr.hbm [resolvable:$true] %s26_s16 }
   0x3   :  { %s15_s13 = sshll.u32 %s232_s12, 4  ;;  %s233_s17 = smov 128   ;;  %s16_s13 = int_to_ptr.vmem [resolvable:$true] %s15_s13 }
   0x4   :  { %s234_s18 = smov 8   ;;  %s235_s19 = smov [#allocation4]  }
   0x5   :  { %21 = dma.hbm_to_vmem [thread:$0]  %s14_s11, 384, %s16_s13, [#allocation3], %s233_s17, %s233_s17, %s234_s18  }
   0x6   :  { %s28_s20 = sshll.u32 %s235_s19, 4  ;;  %s29_s20 = int_to_ptr.vmem [resolvable:$true] %s28_s20 }
   0x7   :  { %34 = dma.hbm_to_vmem [thread:$0]  %s27_s16, 2048, %s29_s20, [#allocation5], %s233_s17, %s233_s17, %s234_s18  }
   0x8   :  { %228 = dma.done.wait [#allocation3], 384  }
   0x9   :  { %229 = vsyncadd [#allocation3], 4294966912 }
   0xa   :  { %230 = dma.done.wait [#allocation5], 2048  }
   0xb   :  { %231 = vsyncadd [#allocation5], 4294965248  ;;  %v72_v0 = vld [vmem:[#allocation4] sm:$0xff]  ;;  %v74_v1 = vld [vmem:[#allocation4 + $0x10] sm:$0xff]  ;;  %s236_s0 = smov 1   ;;  %vm46_vm0 = vcmask 146432  }
   0xc   :  { %104 = vrot.lane.b32.xlu0 %v72_v0, %s236_s0  ;;  %108 = vrot.lane.b32.xlu1 %v74_v1, %s236_s0  ;;  %v76_v2 = vld [vmem:[#allocation4 + $0x20] sm:$0xff]  ;;  %v73_v3 = vld [vmem:[#allocation4 + $0x8] sm:$0xff]  ;;  %v75_v4 = vld [vmem:[#allocation4 + $0x18] sm:$0xff]  ;;  %vm49_vm1 = vcmask 140288   ;;  %vm152_vm2 = vcmask 138248  }
   0xd   :  { %112 = vrot.lane.b32.xlu2 %v76_v2, %s236_s0  ;;  %v77_v5 = vld [vmem:[#allocation4 + $0x28] sm:$0xff]  ;;  %v78_v6 = vld [vmem:[#allocation4 + $0x30] sm:$0xff]  ;;  %v79_v7 = vld [vmem:[#allocation4 + $0x38] sm:$0xff] }
   0xe   :  { %v80_v8 = vld [vmem:[#allocation4 + $0x40] sm:$0xff]  ;;  %v81_v9 = vld [vmem:[#allocation4 + $0x48] sm:$0xff]  ;;  %v82_v10 = vld [vmem:[#allocation4 + $0x50] sm:$0xff] }
   0xf   :  { %v83_v11 = vld [vmem:[#allocation4 + $0x58] sm:$0xff]  ;;  %v84_v12 = vld [vmem:[#allocation4 + $0x60] sm:$0xff]  ;;  %v85_v13 = vld [vmem:[#allocation4 + $0x68] sm:$0xff] }
  0x10   :  { %v86_v14 = vld [vmem:[#allocation4 + $0x70] sm:$0xff]  ;;  %v87_v15 = vld [vmem:[#allocation4 + $0x78] sm:$0xff]  ;;  %v43_v16 = vld [vmem:[#allocation2] sm:$0xff] }
  0x11   :  { %v44_v17 = vld [vmem:[#allocation2 + $0x8] sm:$0xff]  ;;  %47 = vst.msk [vmem:[%s412_s2] sm:$0xff] %vm46_vm0, %v43_v16  ;;  %v45_v19 = vld [vmem:[#allocation2 + $0x10] sm:$0x3] }
  0x12   :  { %48 = vst.msk [vmem:[%s412_s2 + $0x8] sm:$0xff] %vm46_vm0, %v44_v17 }
  0x13   :  { %51 = vst.msk [vmem:[%s412_s2 + $0x18] sm:$0xff] %vm46_vm0, %v43_v16 }
  0x14   :  { %106 = vrot.lane.b32.xlu0 %v73_v3, %s236_s0  ;;  %110 = vrot.lane.b32.xlu1 %v75_v4, %s236_s0  ;;  %52 = vst.msk [vmem:[%s412_s2 + $0x20] sm:$0xff] %vm46_vm0, %v44_v17 }
  0x15   :  { %114 = vrot.lane.b32.xlu2 %v77_v5, %s236_s0  ;;  %54 = vst.msk [vmem:[%s412_s2 + $0x30] sm:$0xff] %vm46_vm0, %v43_v16 }
  0x16   :  { %55 = vst.msk [vmem:[%s412_s2 + $0x38] sm:$0xff] %vm46_vm0, %v44_v17 }
  0x17   :  { %57 = vst.msk [vmem:[%s412_s2 + $0x48] sm:$0xff] %vm46_vm0, %v43_v16 }
  0x18   :  { %58 = vst.msk [vmem:[%s412_s2 + $0x50] sm:$0xff] %vm46_vm0, %v44_v17 }
  0x19   :  { %60 = vst.msk [vmem:[%s412_s2 + $0x60] sm:$0xff] %vm46_vm0, %v43_v16 }
  0x1a   :  { %61 = vst.msk [vmem:[%s412_s2 + $0x68] sm:$0xff] %vm46_vm0, %v44_v17 }
  0x1b   :  { %63 = vst.msk [vmem:[%s412_s2 + $0x78] sm:$0xff] %vm46_vm0, %v43_v16 }
  0x1c   :  { %116 = vrot.lane.b32.xlu0 %v78_v6, %s236_s0  ;;  %118 = vrot.lane.b32.xlu1 %v79_v7, %s236_s0  ;;  %64 = vst.msk [vmem:[%s412_s2 + $0x80] sm:$0xff] %vm46_vm0, %v44_v17 }
  0x1d   :  { %120 = vrot.lane.b32.xlu2 %v80_v8, %s236_s0  ;;  %66 = vst.msk [vmem:[%s412_s2 + $0x90] sm:$0xff] %vm46_vm0, %v43_v16 }
  0x1e   :  { %67 = vst.msk [vmem:[%s412_s2 + $0x98] sm:$0xff] %vm46_vm0, %v44_v17 }
  0x1f   :  { %69 = vst.msk [vmem:[%s412_s2 + $0xa8] sm:$0xff] %vm46_vm0, %v43_v16 }
  0x20   :  { %70 = vst.msk [vmem:[%s412_s2 + $0xb0] sm:$0xff] %vm46_vm0, %v44_v17 }
  0x21   :  { %50 = vst.msk [vmem:[%s412_s2 + $0x10] sm:$0x3] %vm49_vm1, %v45_v19 }
  0x22   :  { %53 = vst.msk [vmem:[%s412_s2 + $0x28] sm:$0x3] %vm49_vm1, %v45_v19 }
  0x23   :  { %56 = vst.msk [vmem:[%s412_s2 + $0x40] sm:$0x3] %vm49_vm1, %v45_v19 }
  0x24   :  { %122 = vrot.lane.b32.xlu0 %v81_v9, %s236_s0  ;;  %124 = vrot.lane.b32.xlu1 %v82_v10, %s236_s0  ;;  %59 = vst.msk [vmem:[%s412_s2 + $0x58] sm:$0x3] %vm49_vm1, %v45_v19 }
  0x25   :  { %126 = vrot.lane.b32.xlu2 %v83_v11, %s236_s0  ;;  %62 = vst.msk [vmem:[%s412_s2 + $0x70] sm:$0x3] %vm49_vm1, %v45_v19 }
  0x26   :  { %65 = vst.msk [vmem:[%s412_s2 + $0x88] sm:$0x3] %vm49_vm1, %v45_v19 }
  0x27   :  { %68 = vst.msk [vmem:[%s412_s2 + $0xa0] sm:$0x3] %vm49_vm1, %v45_v19 }
  0x28   :  { %71 = vst.msk [vmem:[%s412_s2 + $0xb8] sm:$0x3] %vm49_vm1, %v45_v19 }
  0x2c   :  { %128 = vrot.lane.b32.xlu0 %v84_v12, %s236_s0  ;;  %130 = vrot.lane.b32.xlu1 %v85_v13, %s236_s0 }
  0x2d   :  { %132 = vrot.lane.b32.xlu2 %v86_v14, %s236_s0 }
  0x34   :  { %134 = vrot.lane.b32.xlu0 %v87_v15, %s236_s0 }
  0x67   :  { %v113_v18 = vpop.permute.xlu2 %112 }
  0x68   :  { %157 = vst.msk [vmem:[%s412_s2 + $0x31] sm:$0xff] %vm152_vm2, %v113_v18 }
  0x6f   :  { %v115_v20 = vpop.permute.xlu2 %114 }
  0x70   :  { %158 = vst.msk [vmem:[%s412_s2 + $0x39] sm:$0xff] %vm152_vm2, %v115_v20 }
  0x77   :  { %v121_v21 = vpop.permute.xlu2 %120 }
  0x78   :  { %161 = vst.msk [vmem:[%s412_s2 + $0x61] sm:$0xff] %vm152_vm2, %v121_v21 }
  0x7e   :  { %v105_v22 = vpop.permute.xlu0 %104  ;;  %v109_v23 = vpop.permute.xlu1 %108 }
  0x7f   :  { %153 = vst.msk [vmem:[%s412_s2 + $0x1] sm:$0xff] %vm152_vm2, %v105_v22  ;;  %v127_v24 = vpop.permute.xlu2 %126 }
  0x80   :  { %155 = vst.msk [vmem:[%s412_s2 + $0x19] sm:$0xff] %vm152_vm2, %v109_v23 }
  0x81   :  { %164 = vst.msk [vmem:[%s412_s2 + $0x81] sm:$0xff] %vm152_vm2, %v127_v24 }
  0x86   :  { %v107_v25 = vpop.permute.xlu0 %106  ;;  %v111_v26 = vpop.permute.xlu1 %110 }
  0x87   :  { %154 = vst.msk [vmem:[%s412_s2 + $0x9] sm:$0xff] %vm152_vm2, %v107_v25  ;;  %v133_v27 = vpop.permute.xlu2 %132 }
  0x88   :  { %156 = vst.msk [vmem:[%s412_s2 + $0x21] sm:$0xff] %vm152_vm2, %v111_v26 }
  0x89   :  { %167 = vst.msk [vmem:[%s412_s2 + $0xa9] sm:$0xff] %vm152_vm2, %v133_v27 }
  0x8e   :  { %v117_v28 = vpop.permute.xlu0 %116  ;;  %v119_v29 = vpop.permute.xlu1 %118 }
  0x8f   :  { %159 = vst.msk [vmem:[%s412_s2 + $0x49] sm:$0xff] %vm152_vm2, %v117_v28 }
  0x90   :  { %160 = vst.msk [vmem:[%s412_s2 + $0x51] sm:$0xff] %vm152_vm2, %v119_v29 }
  0x96   :  { %v123_v30 = vpop.permute.xlu0 %122  ;;  %v125_v31 = vpop.permute.xlu1 %124 }
  0x97   :  { %162 = vst.msk [vmem:[%s412_s2 + $0x69] sm:$0xff] %vm152_vm2, %v123_v30 }
  0x98   :  { %163 = vst.msk [vmem:[%s412_s2 + $0x79] sm:$0xff] %vm152_vm2, %v125_v31 }
  0x9e   :  { %v129_v32 = vpop.permute.xlu0 %128  ;;  %v131_v33 = vpop.permute.xlu1 %130 }
  0x9f   :  { %165 = vst.msk [vmem:[%s412_s2 + $0x91] sm:$0xff] %vm152_vm2, %v129_v32 }
  0xa0   :  { %166 = vst.msk [vmem:[%s412_s2 + $0x99] sm:$0xff] %vm152_vm2, %v131_v33 }
  0xa6   :  { %v135_v34 = vpop.permute.xlu0 %134 }
  0xa7   :  { %168 = vst.msk [vmem:[%s412_s2 + $0xb1] sm:$0xff] %vm152_vm2, %v135_v34 }
  0xa8   :  { %173 = vsyncpa [#allocation3], 1 }
  0xa9   :  { %174 = vsyncpa [#allocation5], 1 }

</bundles_post_ra>
